<compile_context>
chip_gen: v7x
topology: tpu7x:2x2x1
jax: 0.10.0
libtpu: 0.0.40
codegen_flags: <defaults>
</compile_context>

<pallas_src>
import functools
import math

import jax
import jax.numpy as jnp
from jax import lax
from jax.experimental import pallas as pl
from jax.experimental.pallas import tpu as pltpu


def _round_up(x, m):
    return (x + m - 1) // m * m


def _pick_tile(padded_dim, cap, unit):
    """Largest multiple of `unit` that divides `padded_dim` and is <= cap."""
    best = unit
    t = unit
    limit = min(cap, padded_dim)
    while t <= limit:
        if padded_dim % t == 0:
            best = t
        t += unit
    return best


# ---------------------------------------------------------------------------
# Kernels (weights are stored transposed: (K, N))
# ---------------------------------------------------------------------------
def _train_factored_kernel(x_ref, wmu_ref, wsig_ref, eps_i_ref, eps_j_ref,
                           bmu_ref, bsig_ref, o_ref, acc_mu, acc_sig,
                           *, compute_dtype):
    """Small-batch path: two matmuls, zero weight-sized VPU work.

    out = x @ mu_t + ((x * eps_i) @ sigma_t) * eps_j + (b_mu + b_sigma*eps_j)
    """
    k = pl.program_id(2)

    @pl.when(k == 0)
    def _():
        acc_mu[...] = jnp.zeros_like(acc_mu)
        acc_sig[...] = jnp.zeros_like(acc_sig)

    x = x_ref[...]
    x_mu = x.astype(compute_dtype)
    # Fold eps_i into x: (1, tk) sublane-broadcast over a (tm, tk) tile; cheap
    # because tm is small in the regime where this kernel is selected.
    x_sig = (x * eps_i_ref[...]).astype(compute_dtype)

    acc_mu[...] += lax.dot_general(
        x_mu, wmu_ref[...].astype(compute_dtype),
        dimension_numbers=(((1,), (0,)), ((), ())),
        preferred_element_type=jnp.float32)
    acc_sig[...] += lax.dot_general(
        x_sig, wsig_ref[...].astype(compute_dtype),
        dimension_numbers=(((1,), (0,)), ((), ())),
        preferred_element_type=jnp.float32)

    @pl.when(k == pl.num_programs(2) - 1)
    def _():
        eps_j = eps_j_ref[...]                              # (1, tn)
        bias = bmu_ref[...] + bsig_ref[...] * eps_j         # (1, tn) f32
        o_ref[...] = (acc_mu[...] + acc_sig[...] * eps_j + bias).astype(o_ref.dtype)


def _train_combined_kernel(x_ref, wmu_ref, wsig_ref, eps_i_ref, eps_j_ref,
                           bmu_ref, bsig_ref, o_ref, acc_ref,
                           *, compute_dtype):
    """Large-batch (MXU-bound) path: single matmul on the combined weight."""
    k = pl.program_id(2)

    @pl.when(k == 0)
    def _():
        acc_ref[...] = jnp.zeros_like(acc_ref)

    # Factorized noise for this (tk, tn) transposed weight tile; the VPU work
    # here is hidden under the MXU in the regime where this kernel is selected.
    w_eps = eps_i_ref[...] * eps_j_ref[...]                 # (tk,1)*(1,tn) -> (tk,tn)
    w = (wmu_ref[...].astype(jnp.float32)
         + wsig_ref[...].astype(jnp.float32) * w_eps)       # f32 combine (v5e-safe)

    acc_ref[...] += lax.dot_general(
        x_ref[...].astype(compute_dtype), w.astype(compute_dtype),
        dimension_numbers=(((1,), (0,)), ((), ())),
        preferred_element_type=jnp.float32)

    @pl.when(k == pl.num_programs(2) - 1)
    def _():
        bias = bmu_ref[...] + bsig_ref[...] * eps_j_ref[...]
        o_ref[...] = (acc_ref[...] + bias).astype(o_ref.dtype)


def _eval_kernel(x_ref, wmu_ref, bmu_ref, o_ref, acc_ref, *, compute_dtype):
    k = pl.program_id(2)

    @pl.when(k == 0)
    def _():
        acc_ref[...] = jnp.zeros_like(acc_ref)

    acc_ref[...] += lax.dot_general(
        x_ref[...].astype(compute_dtype), wmu_ref[...].astype(compute_dtype),
        dimension_numbers=(((1,), (0,)), ((), ())),
        preferred_element_type=jnp.float32)

    @pl.when(k == pl.num_programs(2) - 1)
    def _():
        o_ref[...] = (acc_ref[...] + bmu_ref[...]).astype(o_ref.dtype)


# ---------------------------------------------------------------------------
# Cold-path parameter packing (call ONCE after init / parameter update)
# ---------------------------------------------------------------------------
def prepare_noisy_linear_params(weight_mu, weight_sigma, bias_mu, bias_sigma,
                                weight_dtype=jnp.float32):
    """Pad to lane-dense 128 multiples, transpose weights to (K, N) so the MXU
    gets a plain [tm,tk]x[tk,tn], and optionally cast the weights to bf16 HBM
    storage (halves the dominant HBM bytes on v6e/v7x).  Biases stay f32."""
    N, K = weight_mu.shape
    Np, Kp = _round_up(N, 128), _round_up(K, 128)

    def pack_weight(w):
        if Np != N or Kp != K:
            w = jnp.pad(w, ((0, Np - N), (0, Kp - K)))
        return jnp.asarray(w.T, dtype=weight_dtype)         # (Kp, Np)

    def pack_bias(b):
        b = b.reshape(1, N).astype(jnp.float32)
        if Np != N:
            b = jnp.pad(b, ((0, 0), (0, Np - N)))
        return b

    return dict(wmu_t=pack_weight(weight_mu), wsig_t=pack_weight(weight_sigma),
                bmu=pack_bias(bias_mu), bsig=pack_bias(bias_sigma),
                out_features=N, in_features=K)


# ---------------------------------------------------------------------------
# Forward wrapper (hot path: only pads x and the tiny noise vectors)
# ---------------------------------------------------------------------------
def noisy_linear_forward(x, prepared, epsilon_i=None, epsilon_j=None,
                         training=True, compute_dtype=None, mode="auto",
                         weight_buffer_count=2):
    wmu_t, wsig_t = prepared["wmu_t"], prepared["wsig_t"]
    bmu, bsig = prepared["bmu"], prepared["bsig"]
    N, K = prepared["out_features"], prepared["in_features"]
    Kp, Np = wmu_t.shape
    M = x.shape[0]
    assert x.shape[1] == K

    if compute_dtype is None:
        compute_dtype = wmu_t.dtype      # bf16 storage -> bf16 MXU feed

    # ---- tile selection (must divide the pre-padded weight dims) ----
    tm = min(512, _round_up(M, 8))
    tk = _pick_tile(Kp, 1024, 128)
    tn = _pick_tile(Np, 512, 128)
    Mp = _round_up(M, tm)
    # v7x megacore: keep >=2 blocks on a parallel axis when N allows it.
    if Mp // tm == 1 and Np // tn == 1 and Np >= 256:
        tn = _pick_tile(Np, Np // 2, 128)
    grid = (Mp // tm, Np // tn, Kp // tk)

    # ---- hot-path pads (x only; skipped entirely when already aligned) ----
    x_p = jnp.pad(x, ((0, Mp - M), (0, Kp - K))) if (Mp != M or Kp != K) else x

    # ---- specs ----
    x_spec = pl.BlockSpec((tm, tk), lambda i, j, k: (i, k))
    w_kwargs = (dict(pipeline_mode=pl.Buffered(weight_buffer_count))
                if weight_buffer_count != 2 else {})
    w_spec = pl.BlockSpec((tk, tn), lambda i, j, k: (k, j), **w_kwargs)
    brow_spec = pl.BlockSpec((1, tn), lambda i, j, k: (0, j))
    out_spec = pl.BlockSpec((tm, tn), lambda i, j, k: (i, j))
    out_shape = jax.ShapeDtypeStruct((Mp, Np), x.dtype)

    # ---- VMEM budget (per-TensorCore; includes in-kernel temporaries) ----
    wb = jnp.dtype(wmu_t.dtype).itemsize
    xb = jnp.dtype(x.dtype).itemsize
    est = (2 * tm * tk * xb           # x tiles, double-buffered
           + 4 * tk * tn * wb         # w_mu + w_sigma tiles, double-buffered
           + 2 * tm * tn * xb         # output tiles
           + 2 * tm * tn * 4          # f32 accumulators
           + 4 * tk * tn * 4          # in-kernel temporaries (w_eps, w, casts)
           + 2 * tm * tk * 4          # x*eps_i / cast temporaries
           + 8 * tn * 4 + 2 * tk * 4)
    vmem_limit = int(min(max(est * 6 // 5, 32 * 1024 * 1024), 56 * 1024 * 1024))
    compiler_params = pltpu.CompilerParams(
        dimension_semantics=("parallel", "parallel", "arbitrary"),
        vmem_limit_bytes=vmem_limit)

    if not training:
        cost = pl.CostEstimate(
            flops=2 * Mp * Np * Kp, transcendentals=0,
            bytes_accessed=Mp * Kp * xb + Kp * Np * wb + Mp * Np * xb + 4 * Np)
        out_p = pl.pallas_call(
            functools.partial(_eval_kernel, compute_dtype=compute_dtype),
            out_shape=out_shape,
            grid_spec=pltpu.PrefetchScalarGridSpec(
                num_scalar_prefetch=0, grid=grid,
                in_specs=[x_spec, w_spec, brow_spec],
                out_specs=out_spec,
                scratch_shapes=[pltpu.VMEM((tm, tn), jnp.float32)]),
            compiler_params=compiler_params,
            cost_estimate=cost,
        )(x_p, wmu_t, bmu)
        return out_p[:M, :N] if (Mp != M or Np != N) else out_p

    assert epsilon_i is not None and epsilon_j is not None
    eps_i_row = epsilon_i.reshape(1, K).astype(jnp.float32)
    eps_j_row = epsilon_j.reshape(1, N).astype(jnp.float32)
    if Kp != K:
        eps_i_row = jnp.pad(eps_i_row, ((0, 0), (0, Kp - K)))
    if Np != N:
        eps_j_row = jnp.pad(eps_j_row, ((0, 0), (0, Np - N)))

    if mode == "auto":
        # Small batch is HBM/VPU-bound -> factored (2 matmuls, no weight-sized
        # VPU pass).  Large batch is MXU-bound -> combined (1 matmul).
        mode = "combined" if M >= 512 else "factored"

    cost = pl.CostEstimate(
        flops=(4 if mode == "factored" else 2) * Mp * Np * Kp + 2 * Np * Kp,
        transcendentals=0,
        bytes_accessed=(Mp * Kp * xb + 2 * Kp * Np * wb + Mp * Np * xb
                        + 4 * (Kp + 3 * Np)))

    if mode == "factored":
        eps_i_spec = pl.BlockSpec((1, tk), lambda i, j, k: (0, k))
        out_p = pl.pallas_call(
            functools.partial(_train_factored_kernel, compute_dtype=compute_dtype),
            out_shape=out_shape,
            grid_spec=pltpu.PrefetchScalarGridSpec(
                num_scalar_prefetch=0, grid=grid,
                in_specs=[x_spec, w_spec, w_spec, eps_i_spec, brow_spec,
                          brow_spec, brow_spec],
                out_specs=out_spec,
                scratch_shapes=[pltpu.VMEM((tm, tn), jnp.float32),
                                pltpu.VMEM((tm, tn), jnp.float32)]),
            compiler_params=compiler_params,
            cost_estimate=cost,
        )(x_p, wmu_t, wsig_t, eps_i_row, eps_j_row, bmu, bsig)
    else:
        eps_i_col = eps_i_row.reshape(Kp, 1)
        eps_i_spec = pl.BlockSpec((tk, 1), lambda i, j, k: (k, 0))
        out_p = pl.pallas_call(
            functools.partial(_train_combined_kernel, compute_dtype=compute_dtype),
            out_shape=out_shape,
            grid_spec=pltpu.PrefetchScalarGridSpec(
                num_scalar_prefetch=0, grid=grid,
                in_specs=[x_spec, w_spec, w_spec, eps_i_spec, brow_spec,
                          brow_spec, brow_spec],
                out_specs=out_spec,
                scratch_shapes=[pltpu.VMEM((tm, tn), jnp.float32)]),
            compiler_params=compiler_params,
            cost_estimate=cost,
        )(x_p, wmu_t, wsig_t, eps_i_col, eps_j_row, bmu, bsig)

    return out_p[:M, :N] if (Mp != M or Np != N) else out_p


# ---------------------------------------------------------------------------
# Plain-JAX glue mirroring reset_parameters() / reset_noise()
# ---------------------------------------------------------------------------
def scale_noise(key, size):
    """NoisyLinear.scale_noise: x.sign() * sqrt(|x|), x ~ N(0,1)."""
    x = jax.random.normal(key, (size,), dtype=jnp.float32)
    return jnp.sign(x) * jnp.sqrt(jnp.abs(x))


def init_noisy_linear(key, in_features, out_features, sigma_init=0.5):
    """reset_parameters() + reset_noise(); noise stays factorized (eps_i, eps_j):
    weight_epsilon = outer(eps_j, eps_i) is never materialized."""
    k_wmu, k_bmu, k_ei, k_ej = jax.random.split(key, 4)
    mu_range = 1.0 / math.sqrt(in_features)

    weight_mu = jax.random.uniform(
        k_wmu, (out_features, in_features), jnp.float32, -mu_range, mu_range)
    bias_mu = jax.random.uniform(
        k_bmu, (out_features,), jnp.float32, -mu_range, mu_range)
    weight_sigma = jnp.full((out_features, in_features),
                            sigma_init / math.sqrt(in_features), jnp.float32)
    bias_sigma = jnp.full((out_features,),
                          sigma_init / math.sqrt(out_features), jnp.float32)

    epsilon_i = scale_noise(k_ei, in_features)     # (in,)
    epsilon_j = scale_noise(k_ej, out_features)    # (out,)  (== bias_epsilon)

    return dict(weight_mu=weight_mu, weight_sigma=weight_sigma,
                bias_mu=bias_mu, bias_sigma=bias_sigma,
                epsilon_i=epsilon_i, epsilon_j=epsilon_j)


if __name__ == "__main__":
    key = jax.random.PRNGKey(0)
    k_params, k_x = jax.random.split(key)

    batch, in_features, out_features = 8, 32, 16
    p = init_noisy_linear(k_params, in_features, out_features, sigma_init=0.5)
    x = jax.random.normal(k_x, (batch, in_features), dtype=jnp.float32)

    # Plain-JAX reference (mirrors the PyTorch forward).
    w_eps = jnp.outer(p["epsilon_j"], p["epsilon_i"])
    w_eff = p["weight_mu"] + p["weight_sigma"] * w_eps
    b_eff = p["bias_mu"] + p["bias_sigma"] * p["epsilon_j"]
    ref_train = x @ w_eff.T + b_eff
    ref_eval = x @ p["weight_mu"].T + p["bias_mu"]

    # --- f32 weight storage (exact path) ---
    prep_f32 = prepare_noisy_linear_params(
        p["weight_mu"], p["weight_sigma"], p["bias_mu"], p["bias_sigma"],
        weight_dtype=jnp.float32)

    out_train = jax.block_until_ready(noisy_linear_forward(
        x, prep_f32, p["epsilon_i"], p["epsilon_j"], training=True))
    out_comb = jax.block_until_ready(noisy_linear_forward(
        x, prep_f32, p["epsilon_i"], p["epsilon_j"], training=True,
        mode="combined"))
    out_eval = jax.block_until_ready(noisy_linear_forward(
        x, prep_f32, training=False))

    assert out_train.shape == (batch, out_features)
    assert out_eval.shape == (batch, out_features)
    assert jnp.allclose(out_train, ref_train, atol=1e-5, rtol=1e-5)
    assert jnp.allclose(out_comb, ref_train, atol=1e-5, rtol=1e-5)
    assert jnp.allclose(out_eval, ref_eval, atol=1e-5, rtol=1e-5)

    # --- bf16 weight storage + bf16 MXU feed (v6e/v7x HBM win); looser tol ---
    prep_bf16 = prepare_noisy_linear_params(
        p["weight_mu"], p["weight_sigma"], p["bias_mu"], p["bias_sigma"],
        weight_dtype=jnp.bfloat16)
    out_bf16 = jax.block_until_ready(noisy_linear_forward(
        x, prep_bf16, p["epsilon_i"], p["epsilon_j"], training=True))
    assert jnp.allclose(out_bf16, ref_train, atol=5e-2, rtol=5e-2)

    print("KERNEL_OK")
</pallas_src>

<mosaic_0001>
module attributes {stable_mosaic.version = 11 : i64} {
  func.func @_train_factored_kernel(%arg0: i32, %arg1: i32, %arg2: i32, %arg3: memref<8x128xf32, #tpu.memory_space<vmem>>, %arg4: memref<128x128xf32, #tpu.memory_space<vmem>>, %arg5: memref<128x128xf32, #tpu.memory_space<vmem>>, %arg6: memref<1x128xf32, #tpu.memory_space<vmem>>, %arg7: memref<1x128xf32, #tpu.memory_space<vmem>>, %arg8: memref<1x128xf32, #tpu.memory_space<vmem>>, %arg9: memref<1x128xf32, #tpu.memory_space<vmem>>, %arg10: memref<8x128xf32, #tpu.memory_space<vmem>>, %arg11: memref<8x128xf32, #tpu.memory_space<vmem>>, %arg12: memref<8x128xf32, #tpu.memory_space<vmem>>) attributes {dimension_semantics = [#tpu.dimension_semantics<parallel>, #tpu.dimension_semantics<parallel>, #tpu.dimension_semantics<arbitrary>], iteration_bounds = array<i64: 1, 1, 1>, scalar_prefetch = 0 : i64, scratch_operands = 2 : i64, tpu.core_type = #tpu.core_type<tc>, window_params = [{transform_indices = @transform_0, window_bounds = array<i64: 8, 128>}, {transform_indices = @transform_1, window_bounds = array<i64: 128, 128>}, {transform_indices = @transform_2, window_bounds = array<i64: 128, 128>}, {transform_indices = @transform_3, window_bounds = array<i64: 1, 128>}, {transform_indices = @transform_4, window_bounds = array<i64: 1, 128>}, {transform_indices = @transform_5, window_bounds = array<i64: 1, 128>}, {transform_indices = @transform_6, window_bounds = array<i64: 1, 128>}, {transform_indices = @transform_7, window_bounds = array<i64: 8, 128>}]} {
    %c0_i32 = arith.constant 0 : i32
    %0 = arith.cmpi eq, %arg2, %c0_i32 : i32
    %1 = arith.extui %0 : i1 to i32
    %c0_i32_0 = arith.constant 0 : i32
    %2 = arith.cmpi ne, %1, %c0_i32_0 : i32
    scf.if %2 {
      %cst_19 = arith.constant 0.000000e+00 : f32
      %20 = vector.broadcast %cst_19 : f32 to vector<8x128xf32>
      %c0_20 = arith.constant 0 : index
      %c0_21 = arith.constant 0 : index
      %21 = vector.load %arg11[%c0_20, %c0_21] : memref<8x128xf32, #tpu.memory_space<vmem>>, vector<8x128xf32>
      tpu.vector_store %arg11[%c0_20, %c0_21], %20 {strides = array<i32>} : memref<8x128xf32, #tpu.memory_space<vmem>>, vector<8x128xf32>,
      %cst_22 = arith.constant 0.000000e+00 : f32
      %22 = vector.broadcast %cst_22 : f32 to vector<8x128xf32>
      %c0_23 = arith.constant 0 : index
      %c0_24 = arith.constant 0 : index
      %23 = vector.load %arg12[%c0_23, %c0_24] : memref<8x128xf32, #tpu.memory_space<vmem>>, vector<8x128xf32>
      tpu.vector_store %arg12[%c0_23, %c0_24], %22 {strides = array<i32>} : memref<8x128xf32, #tpu.memory_space<vmem>>, vector<8x128xf32>,
    } else {
    }
    %c0 = arith.constant 0 : index
    %c0_1 = arith.constant 0 : index
    %3 = vector.load %arg3[%c0, %c0_1] : memref<8x128xf32, #tpu.memory_space<vmem>>, vector<8x128xf32>
    %c0_2 = arith.constant 0 : index
    %c0_3 = arith.constant 0 : index
    %4 = vector.load %arg6[%c0_2, %c0_3] : memref<1x128xf32, #tpu.memory_space<vmem>>, vector<1x128xf32>
    %5 = vector.broadcast %4 : vector<1x128xf32> to vector<8x128xf32>
    %6 = arith.mulf %3, %5 : vector<8x128xf32>
    %c0_4 = arith.constant 0 : index
    %c0_5 = arith.constant 0 : index
    %7 = vector.load %arg11[%c0_4, %c0_5] : memref<8x128xf32, #tpu.memory_space<vmem>>, vector<8x128xf32>
    %c0_6 = arith.constant 0 : index
    %c0_7 = arith.constant 0 : index
    %8 = vector.load %arg4[%c0_6, %c0_7] : memref<128x128xf32, #tpu.memory_space<vmem>>, vector<128x128xf32>
    %cst = arith.constant dense<0.000000e+00> : vector<8x128xf32>
    %9 = tpu.matmul %3, %8, %cst {dimension_numbers = #tpu.dot_dimension_numbers<[1], [0], [0], [1], [0, 0, 1, 1], [], []>} : vector<8x128xf32>, vector<128x128xf32>, vector<8x128xf32> -> vector<8x128xf32>
    %10 = arith.addf %7, %9 : vector<8x128xf32>
    %c0_8 = arith.constant 0 : index
    %c0_9 = arith.constant 0 : index
    %11 = vector.load %arg11[%c0_8, %c0_9] : memref<8x128xf32, #tpu.memory_space<vmem>>, vector<8x128xf32>
    tpu.vector_store %arg11[%c0_8, %c0_9], %10 {strides = array<i32>} : memref<8x128xf32, #tpu.memory_space<vmem>>, vector<8x128xf32>,
    %c0_10 = arith.constant 0 : index
    %c0_11 = arith.constant 0 : index
    %12 = vector.load %arg12[%c0_10, %c0_11] : memref<8x128xf32, #tpu.memory_space<vmem>>, vector<8x128xf32>
    %c0_12 = arith.constant 0 : index
    %c0_13 = arith.constant 0 : index
    %13 = vector.load %arg5[%c0_12, %c0_13] : memref<128x128xf32, #tpu.memory_space<vmem>>, vector<128x128xf32>
    %cst_14 = arith.constant dense<0.000000e+00> : vector<8x128xf32>
    %14 = tpu.matmul %6, %13, %cst_14 {dimension_numbers = #tpu.dot_dimension_numbers<[1], [0], [0], [1], [0, 0, 1, 1], [], []>} : vector<8x128xf32>, vector<128x128xf32>, vector<8x128xf32> -> vector<8x128xf32>
    %15 = arith.addf %12, %14 : vector<8x128xf32>
    %c0_15 = arith.constant 0 : index
    %c0_16 = arith.constant 0 : index
    %16 = vector.load %arg12[%c0_15, %c0_16] : memref<8x128xf32, #tpu.memory_space<vmem>>, vector<8x128xf32>
    tpu.vector_store %arg12[%c0_15, %c0_16], %15 {strides = array<i32>} : memref<8x128xf32, #tpu.memory_space<vmem>>, vector<8x128xf32>,
    %c0_i32_17 = arith.constant 0 : i32
    %17 = arith.cmpi eq, %arg2, %c0_i32_17 : i32
    %18 = arith.extui %17 : i1 to i32
    %c0_i32_18 = arith.constant 0 : i32
    %19 = arith.cmpi ne, %18, %c0_i32_18 : i32
    scf.if %19 {
      %c0_19 = arith.constant 0 : index
      %c0_20 = arith.constant 0 : index
      %20 = vector.load %arg7[%c0_19, %c0_20] : memref<1x128xf32, #tpu.memory_space<vmem>>, vector<1x128xf32>
      %c0_21 = arith.constant 0 : index
      %c0_22 = arith.constant 0 : index
      %21 = vector.load %arg8[%c0_21, %c0_22] : memref<1x128xf32, #tpu.memory_space<vmem>>, vector<1x128xf32>
      %c0_23 = arith.constant 0 : index
      %c0_24 = arith.constant 0 : index
      %22 = vector.load %arg9[%c0_23, %c0_24] : memref<1x128xf32, #tpu.memory_space<vmem>>, vector<1x128xf32>
      %23 = arith.mulf %22, %20 : vector<1x128xf32>
      %24 = arith.addf %21, %23 : vector<1x128xf32>
      %c0_25 = arith.constant 0 : index
      %c0_26 = arith.constant 0 : index
      %25 = vector.load %arg11[%c0_25, %c0_26] : memref<8x128xf32, #tpu.memory_space<vmem>>, vector<8x128xf32>
      %c0_27 = arith.constant 0 : index
      %c0_28 = arith.constant 0 : index
      %26 = vector.load %arg12[%c0_27, %c0_28] : memref<8x128xf32, #tpu.memory_space<vmem>>, vector<8x128xf32>
      %27 = vector.broadcast %20 : vector<1x128xf32> to vector<8x128xf32>
      %28 = arith.mulf %26, %27 : vector<8x128xf32>
      %29 = arith.addf %25, %28 : vector<8x128xf32>
      %30 = vector.broadcast %24 : vector<1x128xf32> to vector<8x128xf32>
      %31 = arith.addf %29, %30 : vector<8x128xf32>
      %c0_29 = arith.constant 0 : index
      %c0_30 = arith.constant 0 : index
      %32 = vector.load %arg10[%c0_29, %c0_30] : memref<8x128xf32, #tpu.memory_space<vmem>>, vector<8x128xf32>
      tpu.vector_store %arg10[%c0_29, %c0_30], %31 {strides = array<i32>} : memref<8x128xf32, #tpu.memory_space<vmem>>, vector<8x128xf32>,
    } else {
    }
    return
  }
  func.func @transform_0(%arg0: i32, %arg1: i32, %arg2: i32) -> (i32, i32) {
    %c0_i32 = arith.constant 0 : i32
    return %arg0, %arg2 : i32, i32
  }
  func.func @transform_1(%arg0: i32, %arg1: i32, %arg2: i32) -> (i32, i32) {
    %c0_i32 = arith.constant 0 : i32
    return %arg2, %arg1 : i32, i32
  }
  func.func @transform_2(%arg0: i32, %arg1: i32, %arg2: i32) -> (i32, i32) {
    %c0_i32 = arith.constant 0 : i32
    return %arg2, %arg1 : i32, i32
  }
  func.func @transform_3(%arg0: i32, %arg1: i32, %arg2: i32) -> (i32, i32) {
    %c0_i32 = arith.constant 0 : i32
    %c0_i32_0 = arith.constant 0 : i32
    return %c0_i32, %arg2 : i32, i32
  }
  func.func @transform_4(%arg0: i32, %arg1: i32, %arg2: i32) -> (i32, i32) {
    %c0_i32 = arith.constant 0 : i32
    %c0_i32_0 = arith.constant 0 : i32
    return %c0_i32, %arg1 : i32, i32
  }
  func.func @transform_5(%arg0: i32, %arg1: i32, %arg2: i32) -> (i32, i32) {
    %c0_i32 = arith.constant 0 : i32
    %c0_i32_0 = arith.constant 0 : i32
    return %c0_i32, %arg1 : i32, i32
  }
  func.func @transform_6(%arg0: i32, %arg1: i32, %arg2: i32) -> (i32, i32) {
    %c0_i32 = arith.constant 0 : i32
    %c0_i32_0 = arith.constant 0 : i32
    return %c0_i32, %arg1 : i32, i32
  }
  func.func @transform_7(%arg0: i32, %arg1: i32, %arg2: i32) -> (i32, i32) {
    %c0_i32 = arith.constant 0 : i32
    return %arg0, %arg1 : i32, i32
  }
}

</mosaic_0001>

<bundles_post_ra>
// kernel: tpu_custom_call.1
= control target key start
LH: loop header
LB: loop body
LE: loop exit
PB: predicated region body
PF: predicated region fallthrough
CT: control target
= control target key end

     0   :  { %12 = vsyncpa [#allocation5], 0  ;;  %s688_s0 = inlined_call_operand.hbm [shape: f32[8,128], index: 0, kind: input, shape index: {}]   ;;  %s689_s1 = inlined_call_operand.hbm [shape: f32[128,128], index: 1, kind: input, shape index: {}]   ;;  %s690_s2 = inlined_call_operand.hbm [shape: f32[128,128], index: 2, kind: input, shape index: {}]   ;;  %s691_s3 = inlined_call_operand.vmem [shape: f32[1,128], index: 3, kind: input, shape index: {}]   ;;  %s692_s4 = inlined_call_operand.vmem [shape: f32[1,128], index: 4, kind: input, shape index: {}]   ;;  %s693_s5 = inlined_call_operand.vmem [shape: f32[1,128], index: 5, kind: input, shape index: {}]   ;;  %s694_s6 = inlined_call_operand.vmem [shape: f32[1,128], index: 6, kind: input, shape index: {}]   ;;  %s695_s7 = inlined_call_operand.hbm [shape: f32[8,128], index: 7, kind: output, shape index: {}]  }
   0x1   :  { %13 = vsyncpa [#allocation8], 0 }
   0x2   :  { %14 = vsyncpa [#allocation6], 0  ;;  %s557_s24 = smov [#allocation7]   ;;  %s463_s28 = scalar_lea.hbm %s689_s1, 2048 }
   0x3   :  { %s30_s25 = sshll.u32 %s557_s24, 4  ;;  %p464_p0 = scmp.ne.s32.totalorder %s689_s1, %s463_s28  ;;  %s31_s25 = int_to_ptr.vmem [resolvable:$true] %s30_s25 }
   0x4   :  { %p467_p1 = scmp.lt.u32.totalorder %s463_s28, %s689_s1 }
   0x6   :  { %p469_p2 = pnand %p467_p1, %p464_p0 }
   0x8   :  { %472 = shalt.err (!%p469_p2)
}
   0x9   :  { %s473_s10 = scalar_lea.vmem %s31_s25, 2048  ;;  %p478_p4 = scmp.lt.s32.totalorder %s31_s25, %s31_s25 }
   0xa   :  { %p474_p3 = scmp.ne.s32.totalorder %s31_s25, %s473_s10  ;;  %p479_p5 = scmp.lt.s32.totalorder %s473_s10, %s473_s10 }
   0xc   :  { %p480_p6 = por %p479_p5, %p478_p4 }
   0xe   :  { %p481_p7 = pnand %p480_p6, %p474_p3 }
  0x10   :  { %484 = shalt.err (!%p481_p7)
}
  0x11   :  { %s558_s11 = smov 128   ;;  %s559_s12 = smov 8  }
  0x12   :  { %36 = dma.hbm_to_vmem [thread:$0]  %s689_s1, 2048, %s31_s25, [#allocation8], %s558_s11, %s558_s11, %s559_s12  }
  0x13   :  { %s560_s15 = smov [#allocation4]   ;;  %s561_s17 = smov [#allocation9]  }
  0x14   :  { %s21_s16 = sshll.u32 %s560_s15, 4  ;;  %s42_s18 = sshll.u32 %s561_s17, 4  ;;  %s22_s16 = int_to_ptr.vmem [resolvable:$true] %s21_s16  ;;  %s43_s18 = int_to_ptr.vmem [resolvable:$true] %s42_s18 }
  0x15   :  { %s485_s21 = scalar_lea.hbm %s688_s0, 128 }
  0x16   :  { %p486_p8 = scmp.ne.s32.totalorder %s688_s0, %s485_s21  ;;  %p489_p9 = scmp.lt.u32.totalorder %s485_s21, %s688_s0 }
  0x18   :  { %p491_p10 = pnand %p489_p9, %p486_p8 }
  0x1a   :  { %494 = shalt.err (!%p491_p10)
}
  0x1b   :  { %s495_s1 = scalar_lea.vmem %s22_s16, 128  ;;  %p500_p12 = scmp.lt.s32.totalorder %s22_s16, %s22_s16 }
  0x1c   :  { %p496_p11 = scmp.ne.s32.totalorder %s22_s16, %s495_s1  ;;  %p501_p13 = scmp.lt.s32.totalorder %s495_s1, %s495_s1 }
  0x1e   :  { %p502_p0 = por %p501_p13, %p500_p12 }
  0x20   :  { %p503_p1 = pnand %p502_p0, %p496_p11 }
  0x22   :  { %506 = shalt.err (!%p503_p1)
}
  0x23   :  { %24 = dma.hbm_to_vmem [thread:$0]  %s688_s0, 128, %s22_s16, [#allocation5]  }
  0x24   :  { %s507_s30 = scalar_lea.hbm %s690_s2, 2048 }
  0x25   :  { %p508_p2 = scmp.ne.s32.totalorder %s690_s2, %s507_s30  ;;  %p511_p3 = scmp.lt.u32.totalorder %s507_s30, %s690_s2 }
  0x27   :  { %p513_p4 = pnand %p511_p3, %p508_p2 }
  0x29   :  { %516 = shalt.err (!%p513_p4)
}
  0x2a   :  { %s517_s14 = scalar_lea.vmem %s43_s18, 2048  ;;  %p522_p6 = scmp.lt.s32.totalorder %s43_s18, %s43_s18 }
  0x2b   :  { %p518_p5 = scmp.ne.s32.totalorder %s43_s18, %s517_s14  ;;  %p523_p7 = scmp.lt.s32.totalorder %s517_s14, %s517_s14 }
  0x2d   :  { %p524_p8 = por %p523_p7, %p522_p6 }
  0x2f   :  { %p525_p9 = pnand %p524_p8, %p518_p5 }
  0x31   :  { %528 = shalt.err (!%p525_p9)
}
  0x32   :  { %48 = dma.hbm_to_vmem [thread:$0]  %s690_s2, 2048, %s43_s18, [#allocation8], %s558_s11, %s558_s11, %s559_s12  }
  0x33   :  { %551 = dma.done.wait [#allocation5], 128  }
  0x34   :  { %552 = vsyncadd [#allocation5], 4294967168 }
  0x35   :  { %553 = dma.done.wait [#allocation8], 4096  }
  0x36   :  { %554 = vsyncadd [#allocation8], 4294963200  ;;  %v562_v0 = vmov 0.0|0.0   ;;  %vm563_vm0 = vmmov 0   ;;  %v564_v1 = vmov 0.0   ;;  %v171_v2 = vld [vmem:[#allocation9] sm:$0xff]  ;;  %v270_v53 = vlaneseq }
  0x37   :  { %430 = vmatprep.subr.bf16.mxu1 %v562_v0  ;;  %406 = vmatprep.subr.bf16.mxu0 %v562_v0  ;;  %v172_v3 = vld [vmem:[#allocation9 + $0x8] sm:$0xff]  ;;  %v82_v4 = vld [vmem:[#allocation7] sm:$0xff]  ;;  %v173_v7 = vld [vmem:[#allocation9 + $0x10] sm:$0xff]  ;;  %s565_s20 = smov [#allocation10]  }
  0x38   :  { %403 = vmatprep.mubr.msk.f32.mxu1 %vm563_vm0, %v564_v1  ;;  %368 = vmatprep.mubr.msk.f32.mxu0 %vm563_vm0, %v564_v1  ;;  %v431_v5 = vpack.c.bf16 %v172_v3, %v171_v2  ;;  %v83_v6 = vld [vmem:[#allocation7 + $0x8] sm:$0xff]  ;;  %v174_v8 = vld [vmem:[#allocation9 + $0x18] sm:$0xff]  ;;  %v84_v10 = vld [vmem:[#allocation7 + $0x10] sm:$0xff]  ;;  %v271_v54 = vshrl.u32 %v270_v53, 7 }
  0x39   :  { %v407_v9 = vpack.c.bf16 %v83_v6, %v82_v4  ;;  %v85_v11 = vld [vmem:[#allocation7 + $0x18] sm:$0xff]  ;;  %v434_v12 = vpack.c.bf16 %v174_v8, %v173_v7  ;;  %v175_v14 = vld [vmem:[#allocation9 + $0x20] sm:$0xff]  ;;  %v176_v15 = vld [vmem:[#allocation9 + $0x28] sm:$0xff] }
  0x3a   :  { %432 = vmatpush3.bf16.msra.mxu1 %v431_v5  ;;  %v410_v13 = vpack.c.bf16 %v85_v11, %v84_v10  ;;  %v86_v16 = vld [vmem:[#allocation7 + $0x20] sm:$0xff]  ;;  %v87_v17 = vld [vmem:[#allocation7 + $0x28] sm:$0xff]  ;;  %v437_v18 = vpack.c.bf16 %v176_v15, %v175_v14  ;;  %v177_v20 = vld [vmem:[#allocation9 + $0x30] sm:$0xff]  ;;  %v272_v58 = vsub.s32 0, %v271_v54 }
  0x3b   :  { %408 = vmatpush3.bf16.msra.mxu0 %v407_v9  ;;  %433 = vmatprep.subr.bf16.mxu1 %v562_v0  ;;  %v413_v19 = vpack.c.bf16 %v87_v17, %v86_v16  ;;  %v178_v21 = vld [vmem:[#allocation9 + $0x38] sm:$0xff]  ;;  %v88_v22 = vld [vmem:[#allocation7 + $0x30] sm:$0xff]  ;;  %v179_v26 = vld [vmem:[#allocation9 + $0x40] sm:$0xff] }
  0x3c   :  { %409 = vmatprep.subr.bf16.mxu0 %v562_v0  ;;  %v89_v23 = vld [vmem:[#allocation7 + $0x38] sm:$0xff]  ;;  %v440_v24 = vpack.c.bf16 %v178_v21, %v177_v20  ;;  %v180_v27 = vld [vmem:[#allocation9 + $0x48] sm:$0xff]  ;;  %v90_v28 = vld [vmem:[#allocation7 + $0x40] sm:$0xff] }
  0x3d   :  { %v416_v25 = vpack.c.bf16 %v89_v23, %v88_v22  ;;  %v91_v29 = vld [vmem:[#allocation7 + $0x48] sm:$0xff]  ;;  %v443_v30 = vpack.c.bf16 %v180_v27, %v179_v26  ;;  %v181_v32 = vld [vmem:[#allocation9 + $0x50] sm:$0xff]  ;;  %v182_v33 = vld [vmem:[#allocation9 + $0x58] sm:$0xff] }
  0x3e   :  { %435 = vmatpush3.bf16.msra.mxu1 %v434_v12  ;;  %v419_v31 = vpack.c.bf16 %v91_v29, %v90_v28  ;;  %v92_v34 = vld [vmem:[#allocation7 + $0x50] sm:$0xff]  ;;  %v93_v35 = vld [vmem:[#allocation7 + $0x58] sm:$0xff]  ;;  %v446_v36 = vpack.c.bf16 %v182_v33, %v181_v32  ;;  %v183_v38 = vld [vmem:[#allocation9 + $0x60] sm:$0xff] }
  0x3f   :  { %411 = vmatpush3.bf16.msra.mxu0 %v410_v13  ;;  %436 = vmatprep.subr.bf16.mxu1 %v562_v0  ;;  %v422_v37 = vpack.c.bf16 %v93_v35, %v92_v34  ;;  %v184_v39 = vld [vmem:[#allocation9 + $0x68] sm:$0xff]  ;;  %v94_v40 = vld [vmem:[#allocation7 + $0x60] sm:$0xff]  ;;  %v185_v44 = vld [vmem:[#allocation9 + $0x70] sm:$0xff] }
  0x40   :  { %412 = vmatprep.subr.bf16.mxu0 %v562_v0  ;;  %v95_v41 = vld [vmem:[#allocation7 + $0x68] sm:$0xff]  ;;  %v449_v42 = vpack.c.bf16 %v184_v39, %v183_v38  ;;  %v186_v45 = vld [vmem:[#allocation9 + $0x78] sm:$0xff]  ;;  %v96_v46 = vld [vmem:[#allocation7 + $0x70] sm:$0xff] }
  0x41   :  { %v425_v43 = vpack.c.bf16 %v95_v41, %v94_v40  ;;  %v97_v47 = vld [vmem:[#allocation7 + $0x78] sm:$0xff]  ;;  %v452_v48 = vpack.c.bf16 %v186_v45, %v185_v44 }
  0x42   :  { %438 = vmatpush3.bf16.msra.mxu1 %v437_v18  ;;  %v72_v49 = vld [vmem:[#allocation4] sm:$0xff]  ;;  %v428_v51 = vpack.c.bf16 %v97_v47, %v96_v46 }
  0x43   :  { %414 = vmatpush3.bf16.msra.mxu0 %v413_v19  ;;  %439 = vmatprep.subr.bf16.mxu1 %v562_v0  ;;  %v301_v50 = vld [vmem:[%s691_s3] ss:$0 sm:$0xff] }
  0x44   :  { %415 = vmatprep.subr.bf16.mxu0 %v562_v0  ;;  %v80_v52 = vmul.f32 %v301_v50, %v72_v49  ;;  %v262_v55 = vld [vmem:[%s692_s4] sm:$0x1]  ;;  %s291_s4 = sshll.u32 %s565_s20, 4  ;;  %s292_s4 = int_to_ptr.vmem [resolvable:$true] %s291_s4 }
  0x45   :  { %v264_v56 = vld [vmem:[%s694_s6] sm:$0x1]  ;;  %v273_v60 = vrot.slane %v262_v55, %v272_v58  ;;  %s529_s6 = scalar_lea.vmem %s292_s4, 128  ;;  %p534_p11 = scmp.lt.s32.totalorder %s292_s4, %s292_s4 }
  0x46   :  { %441 = vmatpush3.bf16.msra.mxu1 %v440_v24  ;;  %v265_v57 = vmul.f32 %v264_v56, %v262_v55  ;;  %v263_v59 = vld [vmem:[%s693_s5] sm:$0x1]  ;;  %p530_p10 = scmp.ne.s32.totalorder %s292_s4, %s529_s6  ;;  %p535_p12 = scmp.lt.s32.totalorder %s529_s6, %s529_s6 }
  0x47   :  { %417 = vmatpush3.bf16.msra.mxu0 %v416_v25  ;;  %442 = vmatprep.subr.bf16.mxu1 %v562_v0 }
  0x48   :  { %418 = vmatprep.subr.bf16.mxu0 %v562_v0  ;;  %v266_v61 = vadd.f32 %v265_v57, %v263_v59  ;;  %p536_p13 = por %p535_p12, %p534_p11 }
  0x4a   :  { %444 = vmatpush3.bf16.msra.mxu1 %v443_v30  ;;  %v281_v1 = vrot.slane %v266_v61, %v272_v58  ;;  %p537_p0 = pnand %p536_p13, %p530_p10 }
  0x4b   :  { %420 = vmatpush3.bf16.msra.mxu0 %v419_v31  ;;  %445 = vmatprep.subr.bf16.mxu1 %v562_v0 }
  0x4c   :  { %421 = vmatprep.subr.bf16.mxu0 %v562_v0 }
  0x4e   :  { %447 = vmatpush3.bf16.msra.mxu1 %v446_v36 }
  0x4f   :  { %423 = vmatpush3.bf16.msra.mxu0 %v422_v37  ;;  %448 = vmatprep.subr.bf16.mxu1 %v562_v0 }
  0x50   :  { %424 = vmatprep.subr.bf16.mxu0 %v562_v0 }
  0x52   :  { %450 = vmatpush3.bf16.msra.mxu1 %v449_v42 }
  0x53   :  { %426 = vmatpush3.bf16.msra.mxu0 %v425_v43  ;;  %451 = vmatprep.subr.bf16.mxu1 %v562_v0 }
  0x54   :  { %427 = vmatprep.subr.bf16.mxu0 %v562_v0 }
  0x56   :  { %453 = vmatpush3.bf16.msra.mxu1 %v452_v48 }
  0x57   :  { %429 = vmatpush3.bf16.msra.mxu0 %v428_v51 }
  0x59   :  { %404 = vmatmul.mubr.f32.vlgmr.msra.gmra.mrb[0].mxu1 %v80_v52 }
  0x5a   :  { %369 = vmatmul.mubr.f32.vlgmr.msra.gmra.mrb[0].mxu0 %v72_v49 }
 0x12c   :  { %v253_v62 = vpop.f32.mrb[0].mxu1 }
 0x12d   :  { %v275_v63 = vmul.f32 %v273_v60, %v253_v62  ;;  %v164_v0 = vpop.f32.mrb[0].mxu0  ;;  %v405_v2 = vpop.f32.mrb[1].mxu1 }
 0x12e   :  { %v370_v3 = vpop.f32.mrb[1].mxu0 }
 0x12f   :  { %v276_v4 = vadd.f32 %v275_v63, %v164_v0 }
 0x131   :  { %v283_v5 = vadd.f32 %v281_v1, %v276_v4 }
 0x133   :  { %284 = vst [vmem:[#allocation10] sm:$0xff] %v283_v5 }
 0x134   :  { %540 = shalt.err (!%p537_p0)
}
 0x135   :  { %s541_s22 = scalar_lea.hbm %s695_s7, 128 }
 0x136   :  { %p542_p1 = scmp.ne.s32.totalorder %s695_s7, %s541_s22  ;;  %p545_p2 = scmp.lt.u32.totalorder %s541_s22, %s695_s7 }
 0x138   :  { %p547_p3 = pnand %p545_p2, %p542_p1 }
 0x13a   :  { %550 = shalt.err (!%p547_p3)
}
 0x13b   :  { %294 = dma.vmem_to_hbm [thread:$0]  %s292_s4, 128, %s695_s7, [#allocation6]  }
 0x13c   :  { %555 = dma.done.wait [#allocation6], 128  }
 0x13d   :  { %556 = vsyncadd [#allocation6], 4294967168 }
 0x13e   :  { %298 = vsyncpa [#allocation5], 1 }
 0x13f   :  { %299 = vsyncpa [#allocation8], 1 }
 0x140   :  { %300 = vsyncpa [#allocation6], 1 }

</bundles_post_ra>
